<compile_context>
chip_gen: v5e
topology: v5e:2x2
jax: 0.10.0
libtpu: 0.0.40
codegen_flags: <defaults>
</compile_context>

<pallas_src>
import jax
import jax.numpy as jnp
from jax.experimental import pallas as pl
from jax.experimental.pallas import tpu as pltpu

NUMBER_OF_REUSE = 64        # self.number_of_reuse in the PyTorch module
COL_CHUNK = 2048            # lane sub-chunk inside a tile (caps vreg pressure)
SMALL_N_FASTPATH = 8192     # below this, pure-XLA tile is strictly faster


def _round_up(v, m):
    return (v + m - 1) // m * m


def _pick_lane_tile():
    """Generation-specific lane tile (multiple of 128), flag-free VMEM budgets."""
    try:
        kind = jax.devices()[0].device_kind.lower()
    except Exception:
        kind = ""
    if "v5" in kind or "lite" in kind:
        return 16384        # 4 MiB output block, 8 MiB double-buffered (<16 MiB scoped)
    if "v6" in kind or "v7" in kind:
        return 32768        # 8 MiB output block, ~16.5 MiB total (<32 MiB scoped)
    return 16384            # conservative default for unknown chips


def _make_kernel(row_chunk, col_chunk, lane_tile):
    n_row_iters = NUMBER_OF_REUSE // row_chunk
    n_col_iters = lane_tile // col_chunk

    def kernel(x_ref, o_ref):
        # x_ref: (2, lane_tile) VMEM tile ; o_ref: (64, lane_tile) VMEM tile.
        # Static, fully-unrolled loops: live values stay at one (row_chunk,
        # col_chunk) chunk (~16 vregs for f32) no matter how wide the tile is.
        for c in range(n_col_iters):
            cs = c * col_chunk
            # Signed sum kept 2-D / sublane-friendly (no 1-D relayout).
            diff = x_ref[0:1, pl.ds(cs, col_chunk)] - x_ref[1:2, pl.ds(cs, col_chunk)]
            chunk = jnp.broadcast_to(diff, (row_chunk, col_chunk))
            for r in range(n_row_iters):
                o_ref[pl.ds(r * row_chunk, row_chunk), pl.ds(cs, col_chunk)] = chunk

    return kernel


def expect_and_repeat(x, force_pallas=False):
    """JAX/Pallas equivalent of ExpectAndRepeatLayer.forward:
       (1 * x[0] + (-1) * x[1]).repeat(64).

    Accepts x of shape (2,) or (2, N); returns shape (64,) or (64 * N,).
    """
    if x.ndim == 1:
        x = x.reshape(2, 1)
    two, n = x.shape
    assert two == 2, "ExpectAndRepeatLayer expects exactly two rows (x[0], x[1])"

    dtype = x.dtype
    itemsize = jnp.dtype(dtype).itemsize

    # Fast path: for small N the Pallas call is pure fixed overhead; the fused
    # XLA subtract + tile hits the same write roofline and is bit-identical.
    if n < SMALL_N_FASTPATH and not force_pallas:
        return jnp.tile(x[0] - x[1], NUMBER_OF_REUSE)

    # Full-sublane row chunk: 8 for f32, 16 for bf16, 32 for int8/fp8.
    row_chunk = max(8, (8 * 4) // itemsize)
    if NUMBER_OF_REUSE % row_chunk != 0:
        row_chunk = 8

    # Lane tile: large (amortizes ~0.35 us/step), multiple of 128, but capped
    # at ~ceil(N/2) so the grid always has >=2 steps (v7x megacore sharding).
    lane_tile = _pick_lane_tile()
    half = _round_up(max(pl.cdiv(n, 2), 1), 128)
    lane_tile = max(min(lane_tile, half), 128)
    if lane_tile >= COL_CHUNK:
        lane_tile = (lane_tile // COL_CHUNK) * COL_CHUNK   # keep sub-loop exact
        col_chunk = COL_CHUNK
    else:
        col_chunk = lane_tile

    grid = (pl.cdiv(n, lane_tile),)

    # Output is (64, n) with NO padding: the boundary block's writeback is
    # masked by Pallas; the boundary input block's garbage tail columns are
    # never observable.  Final reshape below is a free contiguous bitcast.
    out_2d = pl.pallas_call(
        _make_kernel(row_chunk, col_chunk, lane_tile),
        out_shape=jax.ShapeDtypeStruct((NUMBER_OF_REUSE, n), dtype),
        grid=grid,
        in_specs=[pl.BlockSpec((2, lane_tile), lambda j: (0, j))],
        out_specs=pl.BlockSpec((NUMBER_OF_REUSE, lane_tile), lambda j: (0, j)),
        compiler_params=pltpu.CompilerParams(
            dimension_semantics=("parallel",)),
        cost_estimate=pl.CostEstimate(
            flops=n,
            transcendentals=0,
            bytes_accessed=(2 * n + NUMBER_OF_REUSE * n) * itemsize),
    )(x)

    # torch .repeat(64) on a length-N vector concatenates 64 copies -> (64*N,),
    # exactly the row-major flatten of the (64, N) slab.
    return out_2d.reshape(-1)


if __name__ == "__main__":
    key = jax.random.PRNGKey(0)

    # (1) Small, module-consistent shape (2 measurement rows, length 8):
    #     exercises the tiny-N XLA fast path.
    x_small = jax.random.normal(key, (2, 8), dtype=jnp.float32)
    ref_small = jnp.tile(1.0 * x_small[0] + (-1.0) * x_small[1], NUMBER_OF_REUSE)
    out_small = jax.block_until_ready(expect_and_repeat(x_small))
    assert out_small.shape == (NUMBER_OF_REUSE * x_small.shape[1],), out_small.shape
    assert jnp.allclose(out_small, ref_small, atol=1e-6, rtol=1e-6), "small-N fastpath mismatch"

    # (2) Same small shape pushed through the actual Pallas kernel
    #     (single masked boundary block).
    out_small_pl = jax.block_until_ready(expect_and_repeat(x_small, force_pallas=True))
    assert out_small_pl.shape == ref_small.shape, out_small_pl.shape
    assert jnp.allclose(out_small_pl, ref_small, atol=1e-6, rtol=1e-6), "small-N Pallas mismatch"

    # (3) Ragged N above the fast-path cutoff: tiled, pipelined Pallas kernel
    #     with a masked boundary block and NO host-side pad/slice copy.
    x_big = jax.random.normal(jax.random.PRNGKey(0), (2, 8969), dtype=jnp.float32)
    ref_big = jnp.tile(1.0 * x_big[0] + (-1.0) * x_big[1], NUMBER_OF_REUSE)
    out_big = jax.block_until_ready(expect_and_repeat(x_big))
    assert out_big.shape == (NUMBER_OF_REUSE * x_big.shape[1],), out_big.shape
    assert jnp.allclose(out_big, ref_big, atol=1e-6, rtol=1e-6), "big-N mismatch"

    print("KERNEL_OK")
</pallas_src>

<mosaic_0001>
module attributes {stable_mosaic.version = 11 : i64} {
  func.func @kernel(%arg0: i32, %arg1: memref<2x128xf32, #tpu.memory_space<vmem>>, %arg2: memref<64x128xf32, #tpu.memory_space<vmem>>) attributes {dimension_semantics = [#tpu.dimension_semantics<parallel>], iteration_bounds = array<i64: 1>, scalar_prefetch = 0 : i64, scratch_operands = 0 : i64, tpu.core_type = #tpu.core_type<tc>, window_params = [{transform_indices = @transform_0, window_bounds = array<i64: 2, 128>}, {transform_indices = @transform_1, window_bounds = array<i64: 64, 128>}]} {
    %c0 = arith.constant 0 : index
    %c0_0 = arith.constant 0 : index
    %0 = vector.load %arg1[%c0, %c0_0] : memref<2x128xf32, #tpu.memory_space<vmem>>, vector<1x128xf32>
    %c1 = arith.constant 1 : index
    %c0_1 = arith.constant 0 : index
    %1 = vector.load %arg1[%c1, %c0_1] : memref<2x128xf32, #tpu.memory_space<vmem>>, vector<1x128xf32>
    %2 = arith.subf %0, %1 : vector<1x128xf32>
    %3 = vector.shape_cast %2 : vector<1x128xf32> to vector<1x128xf32>
    %4 = vector.broadcast %3 : vector<1x128xf32> to vector<8x128xf32>
    %c0_2 = arith.constant 0 : index
    %c0_3 = arith.constant 0 : index
    %5 = vector.load %arg2[%c0_2, %c0_3] : memref<64x128xf32, #tpu.memory_space<vmem>>, vector<8x128xf32>
    tpu.vector_store %arg2[%c0_2, %c0_3], %4 {strides = array<i32>} : memref<64x128xf32, #tpu.memory_space<vmem>>, vector<8x128xf32>,
    %c8 = arith.constant 8 : index
    %c0_4 = arith.constant 0 : index
    %6 = vector.load %arg2[%c8, %c0_4] : memref<64x128xf32, #tpu.memory_space<vmem>>, vector<8x128xf32>
    tpu.vector_store %arg2[%c8, %c0_4], %4 {strides = array<i32>} : memref<64x128xf32, #tpu.memory_space<vmem>>, vector<8x128xf32>,
    %c16 = arith.constant 16 : index
    %c0_5 = arith.constant 0 : index
    %7 = vector.load %arg2[%c16, %c0_5] : memref<64x128xf32, #tpu.memory_space<vmem>>, vector<8x128xf32>
    tpu.vector_store %arg2[%c16, %c0_5], %4 {strides = array<i32>} : memref<64x128xf32, #tpu.memory_space<vmem>>, vector<8x128xf32>,
    %c24 = arith.constant 24 : index
    %c0_6 = arith.constant 0 : index
    %8 = vector.load %arg2[%c24, %c0_6] : memref<64x128xf32, #tpu.memory_space<vmem>>, vector<8x128xf32>
    tpu.vector_store %arg2[%c24, %c0_6], %4 {strides = array<i32>} : memref<64x128xf32, #tpu.memory_space<vmem>>, vector<8x128xf32>,
    %c32 = arith.constant 32 : index
    %c0_7 = arith.constant 0 : index
    %9 = vector.load %arg2[%c32, %c0_7] : memref<64x128xf32, #tpu.memory_space<vmem>>, vector<8x128xf32>
    tpu.vector_store %arg2[%c32, %c0_7], %4 {strides = array<i32>} : memref<64x128xf32, #tpu.memory_space<vmem>>, vector<8x128xf32>,
    %c40 = arith.constant 40 : index
    %c0_8 = arith.constant 0 : index
    %10 = vector.load %arg2[%c40, %c0_8] : memref<64x128xf32, #tpu.memory_space<vmem>>, vector<8x128xf32>
    tpu.vector_store %arg2[%c40, %c0_8], %4 {strides = array<i32>} : memref<64x128xf32, #tpu.memory_space<vmem>>, vector<8x128xf32>,
    %c48 = arith.constant 48 : index
    %c0_9 = arith.constant 0 : index
    %11 = vector.load %arg2[%c48, %c0_9] : memref<64x128xf32, #tpu.memory_space<vmem>>, vector<8x128xf32>
    tpu.vector_store %arg2[%c48, %c0_9], %4 {strides = array<i32>} : memref<64x128xf32, #tpu.memory_space<vmem>>, vector<8x128xf32>,
    %c56 = arith.constant 56 : index
    %c0_10 = arith.constant 0 : index
    %12 = vector.load %arg2[%c56, %c0_10] : memref<64x128xf32, #tpu.memory_space<vmem>>, vector<8x128xf32>
    tpu.vector_store %arg2[%c56, %c0_10], %4 {strides = array<i32>} : memref<64x128xf32, #tpu.memory_space<vmem>>, vector<8x128xf32>,
    return
  }
  func.func @transform_0(%arg0: i32) -> (i32, i32) {
    %c0_i32 = arith.constant 0 : i32
    %c0_i32_0 = arith.constant 0 : i32
    return %c0_i32, %arg0 : i32, i32
  }
  func.func @transform_1(%arg0: i32) -> (i32, i32) {
    %c0_i32 = arith.constant 0 : i32
    %c0_i32_0 = arith.constant 0 : i32
    return %c0_i32, %arg0 : i32, i32
  }
}

</mosaic_0001>

<bundles_post_ra>
// kernel: tpu_custom_call.1
= control target key start
LH: loop header
LB: loop body
LE: loop exit
PB: predicated region body
PF: predicated region fallthrough
CT: control target
= control target key end

     0   :  { %6 = vsyncpa [#allocation3], 0  ;;  %s66_s9 = smov [#allocation2]   ;;  %s104_s0 = inlined_call_operand.hbm [shape: f32[2,8], index: 0, kind: input, shape index: {}]   ;;  %s105_s1 = inlined_call_operand.vmem [shape: f32[64,8], index: 1, kind: output, shape index: {}]  }
   0x1   :  { %s12_s8 = sshll.u32 %s104_s0, 4  ;;  %s14_s10 = sshll.u32 %s66_s9, 4  ;;  %s13_s8 = int_to_ptr.hbm [resolvable:$true] %s12_s8  ;;  %s15_s10 = int_to_ptr.vmem [resolvable:$true] %s14_s10 }
   0x2   :  { %17 = dma.hbm_to_vmem [thread:$0]  %s13_s8, 32, %s15_s10, [#allocation3]  }
   0x3   :  { %64 = dma.done.wait [#allocation3], 32  }
   0x4   :  { %65 = vsyncadd [#allocation3], 4294967264  ;;  %v22_v0 = vld [vmem:[#allocation2] sm:$0x1]  ;;  %v23_v1 = vld [vmem:[#allocation2 + $0x1] sm:$0x1] }
   0x5   :  { %v24_v2 = vsub.f32 %v22_v0, %v23_v1 }
   0x7   :  { %v25_v3 = vperm.slane %v24_v2, 0 }
   0x9   :  { %26 = vst [vmem:[%s105_s1] sm:$0xff] %v25_v3 }
   0xa   :  { %27 = vst [vmem:[%s105_s1 + $0x8] sm:$0xff] %v25_v3 }
   0xb   :  { %28 = vst [vmem:[%s105_s1 + $0x10] sm:$0xff] %v25_v3 }
   0xc   :  { %29 = vst [vmem:[%s105_s1 + $0x18] sm:$0xff] %v25_v3 }
   0xd   :  { %30 = vst [vmem:[%s105_s1 + $0x20] sm:$0xff] %v25_v3 }
   0xe   :  { %31 = vst [vmem:[%s105_s1 + $0x28] sm:$0xff] %v25_v3 }
   0xf   :  { %32 = vst [vmem:[%s105_s1 + $0x30] sm:$0xff] %v25_v3 }
  0x10   :  { %33 = vst [vmem:[%s105_s1 + $0x38] sm:$0xff] %v25_v3 }
  0x11   :  { %38 = vsyncpa [#allocation3], 1 }

</bundles_post_ra>
